<compile_context>
chip_gen: v5e
topology: v5e:2x2
jax: 0.10.0
libtpu: 0.0.40
codegen_flags: <defaults>
</compile_context>

<pallas_src>
import jax
import jax.numpy as jnp
from jax.experimental import pallas as pl
from jax.experimental.pallas import tpu as pltpu


# ---------------------------------------------------------------------------
# Kernels
# ---------------------------------------------------------------------------
def _infersent_kernel_fused(x1_ref, x2_ref, o_ref):
    """Default path: dense (tm, 4H) output block, four direct slice stores.

    No concatenate temporary and no sublane-padded layout; when H is a
    multiple of 128 every store is a full-width unmasked vst, otherwise only
    the piece boundaries need masked/offset stores.
    """
    h = x1_ref.shape[-1]
    x1 = x1_ref[...]
    x2 = x2_ref[...]
    o_ref[:, 0 * h:1 * h] = x1
    o_ref[:, 1 * h:2 * h] = x2
    o_ref[:, 2 * h:3 * h] = x1 * x2
    o_ref[:, 3 * h:4 * h] = jnp.abs(x1 - x2)


def _infersent_kernel_piece(x1_ref, x2_ref, o_ref):
    """Large-H path: grid = (rows, h_tiles, piece).

    The output block is a dense (tm, th) tile of the (M, 4H) result; the
    piece index selects which function of (x1, x2) to write.  The input
    block indices do not depend on the piece axis, so Pallas keeps the same
    x1/x2 blocks resident across the 4 consecutive piece steps (no re-fetch).
    """
    p = pl.program_id(2)

    @pl.when(p == 0)
    def _():
        o_ref[...] = x1_ref[...]

    @pl.when(p == 1)
    def _():
        o_ref[...] = x2_ref[...]

    @pl.when(p == 2)
    def _():
        o_ref[...] = x1_ref[...] * x2_ref[...]

    @pl.when(p == 3)
    def _():
        o_ref[...] = jnp.abs(x1_ref[...] - x2_ref[...])


# ---------------------------------------------------------------------------
# Tiling helpers
# ---------------------------------------------------------------------------
def _round_up(x, m):
    return (x + m - 1) // m * m


def _vmem_plan():
    """(block_budget_bytes, vmem_limit_bytes) for double-buffered blocks."""
    try:
        cap = int(pltpu.get_tpu_info().vmem_capacity_bytes)
    except Exception:
        cap = 64 * 1024 * 1024
    # Clamp to 64 MiB: v7x has 64 MiB per TensorCore, and this also guards
    # against get_tpu_info reporting per-chip (2-TC) capacity.
    cap = min(cap, 64 * 1024 * 1024)
    vmem_limit = (cap * 3) // 4            # scoped-VMEM ceiling, with headroom
    block_budget = vmem_limit // 2         # budget for pipelined block buffers
    return block_budget, vmem_limit


def _pick_hidden_tile(h):
    for th in (2048, 1024, 512, 256, 128):
        if h % th == 0:
            return th
    return h  # only reached when h % 128 != 0 (piece path never uses that)


def _pick_row_tile(m, elems_per_row, itemsize, budget_bytes, pack, cap=4096):
    """elems_per_row must already include the 2x double-buffering factor."""
    bytes_per_row = elems_per_row * itemsize
    tm = budget_bytes // max(bytes_per_row, 1)
    tm = min(tm, cap)                      # diminishing returns past a few K rows
    tm = max((tm // pack) * pack, pack)    # keep sublanes packed for the dtype
    tm = min(tm, _round_up(m, pack))       # never exceed the (padded) problem
    return int(tm)


# ---------------------------------------------------------------------------
# Wrapper
# ---------------------------------------------------------------------------
def infersent_aggregation(input_1, input_2):
    """Pallas implementation of InfersentAggregationLayer.forward.

    input_1, input_2: arrays of shape (*, H) with identical shapes/dtypes.
    Returns array of shape (*, 4H).
    """
    assert input_1.shape == input_2.shape
    assert input_1.dtype == input_2.dtype
    *lead, h = input_1.shape
    m = 1
    for d in lead:
        m *= d

    dtype = input_1.dtype
    itemsize = jnp.dtype(dtype).itemsize
    pack = max(8, 32 // itemsize)          # 8 for f32, 16 for bf16, 32 for int8/fp8

    x1 = input_1.reshape(m, h)
    x2 = input_2.reshape(m, h)

    block_budget, vmem_limit = _vmem_plan()

    cost = pl.CostEstimate(
        flops=3 * m * h,                        # mul + sub + abs
        transcendentals=0,
        bytes_accessed=6 * m * h * itemsize,    # read 2*M*H, write 4*M*H
    )

    # Fused-path footprint: 2 bufs * (2*H inputs + 4*H output) elems per row.
    tm_fused_raw = min(block_budget // max(12 * h * itemsize, 1), 4096)
    # Only fall back to the 3-D piece grid when H is lane-aligned AND so large
    # that a fused row tile would be thin (rare; decouples VMEM from H).
    use_piece = (h % 128 == 0) and (tm_fused_raw < 64)

    if not use_piece:
        tm = _pick_row_tile(m, 12 * h, itemsize, block_budget, pack)
        grid = (pl.cdiv(m, tm),)
        out = pl.pallas_call(
            _infersent_kernel_fused,
            out_shape=jax.ShapeDtypeStruct((m, 4 * h), dtype),
            grid_spec=pltpu.PrefetchScalarGridSpec(
                num_scalar_prefetch=0,
                grid=grid,
                in_specs=[
                    pl.BlockSpec((tm, h), lambda i: (i, 0)),
                    pl.BlockSpec((tm, h), lambda i: (i, 0)),
                ],
                out_specs=pl.BlockSpec((tm, 4 * h), lambda i: (i, 0)),
            ),
            compiler_params=pltpu.CompilerParams(
                dimension_semantics=("parallel",),
                vmem_limit_bytes=vmem_limit,
            ),
            cost_estimate=cost,
        )(x1, x2)
    else:
        th = _pick_hidden_tile(h)
        n_h = h // th
        # Piece-path footprint: 2 bufs * (2*th inputs + th output) per row.
        tm = _pick_row_tile(m, 6 * th, itemsize, block_budget, pack)
        grid = (pl.cdiv(m, tm), n_h, 4)
        out = pl.pallas_call(
            _infersent_kernel_piece,
            out_shape=jax.ShapeDtypeStruct((m, 4 * h), dtype),
            grid_spec=pltpu.PrefetchScalarGridSpec(
                num_scalar_prefetch=0,
                grid=grid,
                in_specs=[
                    pl.BlockSpec((tm, th), lambda i, j, p: (i, j)),
                    pl.BlockSpec((tm, th), lambda i, j, p: (i, j)),
                ],
                out_specs=pl.BlockSpec((tm, th),
                                       lambda i, j, p: (i, p * n_h + j)),
            ),
            compiler_params=pltpu.CompilerParams(
                # Row axis sharded across TensorCores; piece axis innermost
                # and "arbitrary" so input blocks are reused across pieces.
                dimension_semantics=("parallel", "arbitrary", "arbitrary"),
                vmem_limit_bytes=vmem_limit,
            ),
            cost_estimate=cost,
        )(x1, x2)

    return out.reshape(*lead, 4 * h)


# ---------------------------------------------------------------------------
# Demo / correctness check
# ---------------------------------------------------------------------------
def _reference(a, b):
    return jnp.concatenate([a, b, a * b, jnp.abs(a - b)], axis=-1)


if __name__ == "__main__":
    key = jax.random.PRNGKey(0)
    ks = jax.random.split(key, 8)

    # Case 1: small hidden (H=32) -> 4H = 128 lane tile, fused dense path.
    a1 = jax.random.normal(ks[0], (2, 8, 32), dtype=jnp.float32)
    a2 = jax.random.normal(ks[1], (2, 8, 32), dtype=jnp.float32)
    o1 = jax.block_until_ready(infersent_aggregation(a1, a2))
    assert o1.shape == (2, 8, 128)
    assert jnp.allclose(o1, _reference(a1, a2)), "mismatch (H=32 f32)"

    # Case 2: lane-aligned hidden (H=128) -> all slice stores 128-aligned.
    b1 = jax.random.normal(ks[2], (2, 8, 128), dtype=jnp.float32)
    b2 = jax.random.normal(ks[3], (2, 8, 128), dtype=jnp.float32)
    o2 = jax.block_until_ready(infersent_aggregation(b1, b2))
    assert o2.shape == (2, 8, 512)
    assert jnp.allclose(o2, _reference(b1, b2)), "mismatch (H=128 f32)"

    # Case 3: ragged row count (M=15), H=384 (boundary padding on rows).
    c1 = jax.random.normal(ks[4], (3, 5, 384), dtype=jnp.float32)
    c2 = jax.random.normal(ks[5], (3, 5, 384), dtype=jnp.float32)
    o3 = jax.block_until_ready(infersent_aggregation(c1, c2))
    assert o3.shape == (3, 5, 1536)
    assert jnp.allclose(o3, _reference(c1, c2)), "mismatch (ragged f32)"

    # Case 4: packed dtype (bf16) routes through the same dense fused path.
    d1 = jax.random.normal(ks[6], (2, 8, 128), dtype=jnp.bfloat16)
    d2 = jax.random.normal(ks[7], (2, 8, 128), dtype=jnp.bfloat16)
    o4 = jax.block_until_ready(infersent_aggregation(d1, d2))
    assert o4.shape == (2, 8, 512)
    assert jnp.allclose(o4.astype(jnp.float32),
                        _reference(d1, d2).astype(jnp.float32)), "mismatch (bf16)"

    print("KERNEL_OK")
</pallas_src>

<mosaic_0001>
module attributes {stable_mosaic.version = 11 : i64} {
  func.func @_infersent_kernel_fused(%arg0: i32, %arg1: memref<16x32xf32, #tpu.memory_space<vmem>>, %arg2: memref<16x32xf32, #tpu.memory_space<vmem>>, %arg3: memref<16x128xf32, #tpu.memory_space<vmem>>) attributes {dimension_semantics = [#tpu.dimension_semantics<parallel>], iteration_bounds = array<i64: 1>, scalar_prefetch = 0 : i64, scratch_operands = 0 : i64, tpu.core_type = #tpu.core_type<tc>, window_params = [{transform_indices = @transform_0, window_bounds = array<i64: 16, 32>}, {transform_indices = @transform_1, window_bounds = array<i64: 16, 32>}, {transform_indices = @transform_2, window_bounds = array<i64: 16, 128>}]} {
    %c0 = arith.constant 0 : index
    %c0_0 = arith.constant 0 : index
    %0 = vector.load %arg1[%c0, %c0_0] : memref<16x32xf32, #tpu.memory_space<vmem>>, vector<16x32xf32>
    %c0_1 = arith.constant 0 : index
    %c0_2 = arith.constant 0 : index
    %1 = vector.load %arg2[%c0_1, %c0_2] : memref<16x32xf32, #tpu.memory_space<vmem>>, vector<16x32xf32>
    %c0_3 = arith.constant 0 : index
    %c0_4 = arith.constant 0 : index
    %2 = vector.load %arg3[%c0_3, %c0_4] : memref<16x128xf32, #tpu.memory_space<vmem>>, vector<16x32xf32>
    tpu.vector_store %arg3[%c0_3, %c0_4], %0 {strides = array<i32>} : memref<16x128xf32, #tpu.memory_space<vmem>>, vector<16x32xf32>,
    %c0_5 = arith.constant 0 : index
    %c32 = arith.constant 32 : index
    %3 = vector.load %arg3[%c0_5, %c32] : memref<16x128xf32, #tpu.memory_space<vmem>>, vector<16x32xf32>
    tpu.vector_store %arg3[%c0_5, %c32], %1 {strides = array<i32>} : memref<16x128xf32, #tpu.memory_space<vmem>>, vector<16x32xf32>,
    %4 = arith.mulf %0, %1 : vector<16x32xf32>
    %c0_6 = arith.constant 0 : index
    %c64 = arith.constant 64 : index
    %5 = vector.load %arg3[%c0_6, %c64] : memref<16x128xf32, #tpu.memory_space<vmem>>, vector<16x32xf32>
    tpu.vector_store %arg3[%c0_6, %c64], %4 {strides = array<i32>} : memref<16x128xf32, #tpu.memory_space<vmem>>, vector<16x32xf32>,
    %6 = arith.subf %0, %1 : vector<16x32xf32>
    %7 = math.absf %6 : vector<16x32xf32>
    %c0_7 = arith.constant 0 : index
    %c96 = arith.constant 96 : index
    %8 = vector.load %arg3[%c0_7, %c96] : memref<16x128xf32, #tpu.memory_space<vmem>>, vector<16x32xf32>
    tpu.vector_store %arg3[%c0_7, %c96], %7 {strides = array<i32>} : memref<16x128xf32, #tpu.memory_space<vmem>>, vector<16x32xf32>,
    return
  }
  func.func @transform_0(%arg0: i32) -> (i32, i32) {
    %c0_i32 = arith.constant 0 : i32
    %c0_i32_0 = arith.constant 0 : i32
    return %arg0, %c0_i32 : i32, i32
  }
  func.func @transform_1(%arg0: i32) -> (i32, i32) {
    %c0_i32 = arith.constant 0 : i32
    %c0_i32_0 = arith.constant 0 : i32
    return %arg0, %c0_i32 : i32, i32
  }
  func.func @transform_2(%arg0: i32) -> (i32, i32) {
    %c0_i32 = arith.constant 0 : i32
    %c0_i32_0 = arith.constant 0 : i32
    return %arg0, %c0_i32 : i32, i32
  }
}

</mosaic_0001>

<bundles_post_ra>
// kernel: tpu_custom_call.1
= control target key start
LH: loop header
LB: loop body
LE: loop exit
PB: predicated region body
PF: predicated region fallthrough
CT: control target
= control target key end

     0   :  { %7 = vsyncpa [#allocation3], 0  ;;  %s237_s0 = inlined_call_operand.hbm [shape: f32[16,32], index: 0, kind: input, shape index: {}]   ;;  %s238_s1 = inlined_call_operand.hbm [shape: f32[16,32], index: 1, kind: input, shape index: {}]   ;;  %s239_s2 = inlined_call_operand.hbm [shape: f32[16,128], index: 2, kind: output, shape index: {}]  }
   0x1   :  { %8 = vsyncpa [#allocation6], 0 }
   0x2   :  { %9 = vsyncpa [#allocation4], 0  ;;  %s14_s11 = sshll.u32 %s237_s0, 4  ;;  %s196_s12 = smov [#allocation2]   ;;  %s15_s11 = int_to_ptr.hbm [resolvable:$true] %s14_s11 }
   0x3   :  { %s16_s13 = sshll.u32 %s196_s12, 4  ;;  %s27_s16 = sshll.u32 %s238_s1, 4  ;;  %s17_s13 = int_to_ptr.vmem [resolvable:$true] %s16_s13  ;;  %s28_s16 = int_to_ptr.hbm [resolvable:$true] %s27_s16 }
   0x4   :  { %s197_s17 = smov 128   ;;  %s198_s18 = smov 8  }
   0x5   :  { %22 = dma.hbm_to_vmem [thread:$0]  %s15_s11, 256, %s17_s13, [#allocation3], %s197_s17, %s197_s17, %s198_s18  }
   0x6   :  { %s199_s19 = smov [#allocation5]  }
   0x7   :  { %s29_s20 = sshll.u32 %s199_s19, 4  ;;  %s30_s20 = int_to_ptr.vmem [resolvable:$true] %s29_s20 }
   0x8   :  { %35 = dma.hbm_to_vmem [thread:$0]  %s28_s16, 256, %s30_s20, [#allocation6], %s197_s17, %s197_s17, %s198_s18  }
   0x9   :  { %190 = dma.done.wait [#allocation3], 256  }
   0xa   :  { %191 = vsyncadd [#allocation3], 4294967040 }
   0xb   :  { %192 = dma.done.wait [#allocation6], 256  }
   0xc   :  { %193 = vsyncadd [#allocation6], 4294967040  ;;  %vm48_vm0 = vcmask 261120   ;;  %v46_v0 = vld [vmem:[#allocation5] sm:$0xff]  ;;  %v44_v1 = vld [vmem:[#allocation2] sm:$0xff]  ;;  %s200_s0 = smov 32  }
   0xd   :  { %53 = vrot.lane.b32.xlu0 %v46_v0, %s200_s0  ;;  %v62_v2 = vmul.f32 %v46_v0, %v44_v1  ;;  %49 = vst.msk [vmem:[#allocation7] sm:$0xff] %vm48_vm0, %v44_v1  ;;  %v45_v3 = vld [vmem:[#allocation2 + $0x8] sm:$0xff]  ;;  %v75_v4 = vsub.f32 %v44_v1, %v46_v0  ;;  %s201_s1 = smov 64   ;;  %v47_v6 = vld [vmem:[#allocation5 + $0x8] sm:$0xff]  ;;  %s202_s21 = smov 96   ;;  %vm59_vm1 = vcmask 523520  }
   0xe   :  { %50 = vst.msk [vmem:[#allocation7 + $0x8] sm:$0xff] %vm48_vm0, %v45_v3  ;;  %v76_v7 = vsub.f32 %v45_v3, %v47_v6  ;;  %v63_v8 = vmul.f32 %v47_v6, %v45_v3  ;;  %vm72_vm2 = vcmask 785920   ;;  %vm87_vm3 = vcmask 1048320   ;;  %s203_s22 = smov [#allocation7]   ;;  %s96_s26 = sshll.u32 %s239_s2, 4  ;;  %s97_s26 = int_to_ptr.hbm [resolvable:$true] %s96_s26 }
   0xf   :  { %66 = vrot.lane.b32.xlu1 %v62_v2, %s201_s1  ;;  %v77_v5 = vand.u32 2147483647, %v75_v4  ;;  %s94_s23 = sshll.u32 %s203_s22, 4  ;;  %s95_s23 = int_to_ptr.vmem [resolvable:$true] %s94_s23 }
  0x10   :  { %v78_v9 = vand.u32 2147483647, %v76_v7 }
  0x11   :  { %81 = vrot.lane.b32.xlu2 %v77_v5, %s202_s21 }
  0x15   :  { %55 = vrot.lane.b32.xlu0 %v47_v6, %s200_s0 }
  0x17   :  { %68 = vrot.lane.b32.xlu1 %v63_v8, %s201_s1 }
  0x19   :  { %83 = vrot.lane.b32.xlu2 %v78_v9, %s202_s21 }
  0x6b   :  { %v82_v10 = vpop.permute.xlu2 %81 }
  0x73   :  { %v84_v14 = vpop.permute.xlu2 %83 }
  0x7f   :  { %v54_v11 = vpop.permute.xlu0 %53 }
  0x80   :  { %60 = vst.msk [vmem:[#allocation7] sm:$0xff] %vm59_vm1, %v54_v11 }
  0x81   :  { %v67_v12 = vpop.permute.xlu1 %66 }
  0x82   :  { %73 = vst.msk [vmem:[#allocation7] sm:$0xff] %vm72_vm2, %v67_v12 }
  0x83   :  { %88 = vst.msk [vmem:[#allocation7] sm:$0xff] %vm87_vm3, %v82_v10 }
  0x87   :  { %v56_v13 = vpop.permute.xlu0 %55 }
  0x88   :  { %61 = vst.msk [vmem:[#allocation7 + $0x8] sm:$0xff] %vm59_vm1, %v56_v13 }
  0x89   :  { %v69_v15 = vpop.permute.xlu1 %68 }
  0x8a   :  { %74 = vst.msk [vmem:[#allocation7 + $0x8] sm:$0xff] %vm72_vm2, %v69_v15 }
  0x8b   :  { %89 = vst.msk [vmem:[#allocation7 + $0x8] sm:$0xff] %vm87_vm3, %v84_v14 }
  0x8c   :  { %102 = dma.vmem_to_hbm [thread:$0]  %s95_s23, 256, %s97_s26, [#allocation4], %s197_s17, %s197_s17, %s198_s18  }
  0x8d   :  { %194 = dma.done.wait [#allocation4], 256  }
  0x8e   :  { %195 = vsyncadd [#allocation4], 4294967040 }
  0x8f   :  { %107 = vsyncpa [#allocation3], 1 }
  0x90   :  { %108 = vsyncpa [#allocation6], 1 }
  0x91   :  { %109 = vsyncpa [#allocation4], 1 }

</bundles_post_ra>
